<compile_context>
chip_gen: v7x
topology: tpu7x:2x2x1
jax: 0.10.0
libtpu: 0.0.40
codegen_flags: <defaults>
</compile_context>

<pallas_src>
import functools

import jax
import jax.numpy as jnp
from jax.experimental import pallas as pl
from jax.experimental.pallas import tpu as pltpu

_LANES = 128
_NEG_BIG = -1e30  # effectively -inf for padded softmax lanes (finite, no NaN)


def _round_up(n, m):
    return ((n + m - 1) // m) * m


def actor_kernel(x_ref, w1_ref, b1_ref, w2_ref, b2_ref, w3_ref, b3_ref, out_ref):
    """Fused 3-layer MLP + softmax over one batch tile (weights resident in VMEM)."""
    # Streamed f32 rows -> bf16 operands for the MXU (f32 accumulate).
    x = x_ref[...].astype(jnp.bfloat16)  # [TB, S]

    # Layer 1: Linear + ReLU (bias-add / ReLU in f32).
    h1 = jnp.dot(x, w1_ref[...], preferred_element_type=jnp.float32) + b1_ref[...]
    h1 = jnp.maximum(h1, 0.0).astype(jnp.bfloat16)

    # Layer 2: Linear + ReLU.
    h2 = jnp.dot(h1, w2_ref[...], preferred_element_type=jnp.float32) + b2_ref[...]
    h2 = jnp.maximum(h2, 0.0).astype(jnp.bfloat16)

    # Layer 3: Linear (lane-padded to 128 output columns; pad bias = -1e30).
    logits = jnp.dot(h2, w3_ref[...], preferred_element_type=jnp.float32) + b3_ref[...]

    # Numerically stable softmax over the (padded) last axis.
    m = jnp.max(logits, axis=-1, keepdims=True)
    e = jnp.exp(logits - m)                     # padded lanes: exp(-1e30 - m) -> 0
    denom = jnp.sum(e, axis=-1, keepdims=True)
    probs = e * pl.reciprocal(denom, approx=True)

    # Store only the real action columns; padded lanes never leave the chip.
    out_ref[...] = probs[:, : out_ref.shape[-1]].astype(out_ref.dtype)


@functools.partial(jax.jit, static_argnames=("block_b",))
def actor_forward(state, w1, b1, w2, b2, w3, b3, *, block_b=2048):
    """state: [B, state_dim] f32; weights stored as [in, out]; biases [1, out]."""
    B, S = state.shape
    H = w1.shape[1]
    A = w3.shape[1]

    # --- lane-dense padding of hidden (H -> mult of 128) and logits (A -> mult of 128)
    H_pad = _round_up(H, _LANES)
    A_pad = _round_up(A, _LANES)

    w1p = jnp.pad(w1, ((0, 0), (0, H_pad - H))).astype(jnp.bfloat16)
    b1p = jnp.pad(b1, ((0, 0), (0, H_pad - H)))                       # f32, zero pad
    w2p = jnp.pad(w2, ((0, H_pad - H), (0, H_pad - H))).astype(jnp.bfloat16)
    b2p = jnp.pad(b2, ((0, 0), (0, H_pad - H)))                       # f32, zero pad
    w3p = jnp.pad(w3, ((0, H_pad - H), (0, A_pad - A))).astype(jnp.bfloat16)
    b3p = jnp.pad(b3, ((0, 0), (0, A_pad - A)), constant_values=_NEG_BIG)  # f32

    # --- batch tiling: big tiles (overhead-bound workload), but keep >= 2 grid
    #     steps when the batch allows so both v7x TensorCores get work.
    B_min = _round_up(B, 8)
    if B_min <= 8:
        TB = 8
    else:
        TB = min(block_b, _round_up((B_min + 1) // 2, 8))
    B_pad = _round_up(B_min, TB)
    if B_pad != B:
        state = jnp.pad(state, ((0, B_pad - B), (0, 0)))
    grid = (B_pad // TB,)

    # Advisory cost estimate for the XLA scheduler.
    cost = pl.CostEstimate(
        flops=2 * B_pad * (S * H_pad + H_pad * H_pad + H_pad * A_pad),
        transcendentals=B_pad * (A_pad + 1),
        bytes_accessed=(4 * B_pad * S + 4 * B_pad * A
                        + 2 * (S * H_pad + H_pad * H_pad + H_pad * A_pad)
                        + 4 * (2 * H_pad + A_pad)),
    )

    out_padded = pl.pallas_call(
        actor_kernel,
        out_shape=jax.ShapeDtypeStruct((B_pad, A), jnp.float32),
        grid=grid,
        in_specs=[
            pl.BlockSpec((TB, S), lambda i: (i, 0)),        # x tile (double-buffered)
            pl.BlockSpec((S, H_pad), lambda i: (0, 0)),     # w1 (resident, bf16)
            pl.BlockSpec((1, H_pad), lambda i: (0, 0)),     # b1 (f32)
            pl.BlockSpec((H_pad, H_pad), lambda i: (0, 0)), # w2 (resident, bf16)
            pl.BlockSpec((1, H_pad), lambda i: (0, 0)),     # b2 (f32)
            pl.BlockSpec((H_pad, A_pad), lambda i: (0, 0)), # w3 (resident, bf16)
            pl.BlockSpec((1, A_pad), lambda i: (0, 0)),     # b3 (f32, -1e30 pad)
        ],
        out_specs=pl.BlockSpec((TB, A), lambda i: (i, 0)),  # unpadded writeback
        compiler_params=pltpu.CompilerParams(
            dimension_semantics=("parallel",),
            vmem_limit_bytes=32 * 1024 * 1024,
        ),
        cost_estimate=cost,
    )(state, w1p, b1p, w2p, b2p, w3p, b3p)

    return out_padded[:B] if B_pad != B else out_padded


def init_params(key, state_dim, action_dim, hidden=64):
    """Deterministic init mimicking PyTorch nn.Linear (uniform +/- 1/sqrt(fan_in))."""
    keys = jax.random.split(key, 6)

    def linear_init(kw, kb, fan_in, fan_out):
        bound = 1.0 / jnp.sqrt(fan_in)
        w = jax.random.uniform(kw, (fan_in, fan_out), jnp.float32, -bound, bound)
        b = jax.random.uniform(kb, (1, fan_out), jnp.float32, -bound, bound)
        return w, b

    w1, b1 = linear_init(keys[0], keys[1], state_dim, hidden)
    w2, b2 = linear_init(keys[2], keys[3], hidden, hidden)
    w3, b3 = linear_init(keys[4], keys[5], hidden, action_dim)
    return w1, b1, w2, b2, w3, b3


if __name__ == "__main__":
    state_dim = 32
    action_dim = 8
    batch = 4

    key = jax.random.PRNGKey(0)
    k_state, k_params = jax.random.split(key)

    state = jax.random.normal(k_state, (batch, state_dim), dtype=jnp.float32)
    params = init_params(k_params, state_dim, action_dim)

    probs = actor_forward(state, *params)
    probs = jax.block_until_ready(probs)

    # Sanity check against a plain-JAX f32 reference of the same forward pass.
    w1, b1, w2, b2, w3, b3 = params
    h1 = jnp.maximum(state @ w1 + b1, 0.0)
    h2 = jnp.maximum(h1 @ w2 + b2, 0.0)
    logits = h2 @ w3 + b3
    ref = jax.nn.softmax(logits, axis=-1)

    assert probs.shape == (batch, action_dim)
    # approx=True reciprocal -> sums within ~1e-3 of 1.
    assert jnp.allclose(jnp.sum(probs, axis=-1), 1.0, atol=2e-3)
    # bf16 MXU operands (f32 accumulate) -> looser tolerance vs f32 reference.
    assert jnp.allclose(probs, ref, atol=3e-2)

    print("KERNEL_OK")
</pallas_src>

<mosaic_0001>
module attributes {stable_mosaic.version = 11 : i64} {
  func.func @actor_kernel(%arg0: i32, %arg1: memref<8x32xf32, #tpu.memory_space<vmem>>, %arg2: memref<32x128xbf16, #tpu.memory_space<vmem>>, %arg3: memref<1x128xf32, #tpu.memory_space<vmem>>, %arg4: memref<128x128xbf16, #tpu.memory_space<vmem>>, %arg5: memref<1x128xf32, #tpu.memory_space<vmem>>, %arg6: memref<128x128xbf16, #tpu.memory_space<vmem>>, %arg7: memref<1x128xf32, #tpu.memory_space<vmem>>, %arg8: memref<8x8xf32, #tpu.memory_space<vmem>>) attributes {dimension_semantics = [#tpu.dimension_semantics<parallel>], iteration_bounds = array<i64: 1>, scalar_prefetch = 0 : i64, scratch_operands = 0 : i64, tpu.core_type = #tpu.core_type<tc>, window_params = [{transform_indices = @transform_0, window_bounds = array<i64: 8, 32>}, {pipeline_mode = #tpu.pipeline_mode<synchronous>, transform_indices = @transform_1, window_bounds = array<i64: 32, 128>}, {pipeline_mode = #tpu.pipeline_mode<synchronous>, transform_indices = @transform_2, window_bounds = array<i64: 1, 128>}, {pipeline_mode = #tpu.pipeline_mode<synchronous>, transform_indices = @transform_3, window_bounds = array<i64: 128, 128>}, {pipeline_mode = #tpu.pipeline_mode<synchronous>, transform_indices = @transform_4, window_bounds = array<i64: 1, 128>}, {pipeline_mode = #tpu.pipeline_mode<synchronous>, transform_indices = @transform_5, window_bounds = array<i64: 128, 128>}, {pipeline_mode = #tpu.pipeline_mode<synchronous>, transform_indices = @transform_6, window_bounds = array<i64: 1, 128>}, {transform_indices = @transform_7, window_bounds = array<i64: 8, 8>}]} {
    %c0 = arith.constant 0 : index
    %c0_0 = arith.constant 0 : index
    %0 = vector.load %arg1[%c0, %c0_0] : memref<8x32xf32, #tpu.memory_space<vmem>>, vector<8x32xf32>
    %1 = arith.truncf %0 : vector<8x32xf32> to vector<8x32xbf16>
    %c0_1 = arith.constant 0 : index
    %c0_2 = arith.constant 0 : index
    %2 = vector.load %arg2[%c0_1, %c0_2] : memref<32x128xbf16, #tpu.memory_space<vmem>>, vector<32x128xbf16>
    %cst = arith.constant dense<0.000000e+00> : vector<8x128xf32>
    %3 = tpu.matmul %1, %2, %cst {dimension_numbers = #tpu.dot_dimension_numbers<[1], [0], [0], [1], [0, 0, 1, 1], [], []>} : vector<8x32xbf16>, vector<32x128xbf16>, vector<8x128xf32> -> vector<8x128xf32>
    %c0_3 = arith.constant 0 : index
    %c0_4 = arith.constant 0 : index
    %4 = vector.load %arg3[%c0_3, %c0_4] : memref<1x128xf32, #tpu.memory_space<vmem>>, vector<1x128xf32>
    %5 = vector.broadcast %4 : vector<1x128xf32> to vector<8x128xf32>
    %6 = arith.addf %3, %5 : vector<8x128xf32>
    %cst_5 = arith.constant 0.000000e+00 : f32
    %7 = vector.broadcast %cst_5 : f32 to vector<8x128xf32>
    %8 = arith.maximumf %6, %7 : vector<8x128xf32>
    %9 = arith.truncf %8 : vector<8x128xf32> to vector<8x128xbf16>
    %c0_6 = arith.constant 0 : index
    %c0_7 = arith.constant 0 : index
    %10 = vector.load %arg4[%c0_6, %c0_7] : memref<128x128xbf16, #tpu.memory_space<vmem>>, vector<128x128xbf16>
    %cst_8 = arith.constant dense<0.000000e+00> : vector<8x128xf32>
    %11 = tpu.matmul %9, %10, %cst_8 {dimension_numbers = #tpu.dot_dimension_numbers<[1], [0], [0], [1], [0, 0, 1, 1], [], []>} : vector<8x128xbf16>, vector<128x128xbf16>, vector<8x128xf32> -> vector<8x128xf32>
    %c0_9 = arith.constant 0 : index
    %c0_10 = arith.constant 0 : index
    %12 = vector.load %arg5[%c0_9, %c0_10] : memref<1x128xf32, #tpu.memory_space<vmem>>, vector<1x128xf32>
    %13 = vector.broadcast %12 : vector<1x128xf32> to vector<8x128xf32>
    %14 = arith.addf %11, %13 : vector<8x128xf32>
    %cst_11 = arith.constant 0.000000e+00 : f32
    %15 = vector.broadcast %cst_11 : f32 to vector<8x128xf32>
    %16 = arith.maximumf %14, %15 : vector<8x128xf32>
    %17 = arith.truncf %16 : vector<8x128xf32> to vector<8x128xbf16>
    %c0_12 = arith.constant 0 : index
    %c0_13 = arith.constant 0 : index
    %18 = vector.load %arg6[%c0_12, %c0_13] : memref<128x128xbf16, #tpu.memory_space<vmem>>, vector<128x128xbf16>
    %cst_14 = arith.constant dense<0.000000e+00> : vector<8x128xf32>
    %19 = tpu.matmul %17, %18, %cst_14 {dimension_numbers = #tpu.dot_dimension_numbers<[1], [0], [0], [1], [0, 0, 1, 1], [], []>} : vector<8x128xbf16>, vector<128x128xbf16>, vector<8x128xf32> -> vector<8x128xf32>
    %c0_15 = arith.constant 0 : index
    %c0_16 = arith.constant 0 : index
    %20 = vector.load %arg7[%c0_15, %c0_16] : memref<1x128xf32, #tpu.memory_space<vmem>>, vector<1x128xf32>
    %21 = vector.broadcast %20 : vector<1x128xf32> to vector<8x128xf32>
    %22 = arith.addf %19, %21 : vector<8x128xf32>
    %cst_17 = arith.constant dense<0xFF800000> : vector<8xf32>
    %23 = vector.multi_reduction <maximumf>, %22, %cst_17 [1] : vector<8x128xf32> to vector<8xf32>
    %24 = vector.shape_cast %23 : vector<8xf32> to vector<8x1xf32>
    %25 = vector.broadcast %24 : vector<8x1xf32> to vector<8x128xf32>
    %26 = arith.subf %22, %25 : vector<8x128xf32>
    %27 = math.exp %26 : vector<8x128xf32>
    %cst_18 = arith.constant dense<0.000000e+00> : vector<8xf32>
    %28 = vector.multi_reduction <add>, %27, %cst_18 [1] : vector<8x128xf32> to vector<8xf32>
    %29 = vector.shape_cast %28 : vector<8xf32> to vector<8x1xf32>
    %30 = tpu.reciprocal %29 {approx = true} : vector<8x1xf32> -> vector<8x1xf32>
    %31 = vector.broadcast %30 : vector<8x1xf32> to vector<8x128xf32>
    %32 = arith.mulf %27, %31 : vector<8x128xf32>
    %33 = vector.extract_strided_slice %32 {offsets = [0, 0], sizes = [8, 8], strides = [1, 1]} : vector<8x128xf32> to vector<8x8xf32>
    %c0_19 = arith.constant 0 : index
    %c0_20 = arith.constant 0 : index
    %34 = vector.load %arg8[%c0_19, %c0_20] : memref<8x8xf32, #tpu.memory_space<vmem>>, vector<8x8xf32>
    tpu.vector_store %arg8[%c0_19, %c0_20], %33 {strides = array<i32>} : memref<8x8xf32, #tpu.memory_space<vmem>>, vector<8x8xf32>,
    return
  }
  func.func @transform_0(%arg0: i32) -> (i32, i32) {
    %c0_i32 = arith.constant 0 : i32
    %c0_i32_0 = arith.constant 0 : i32
    return %arg0, %c0_i32 : i32, i32
  }
  func.func @transform_1(%arg0: i32) -> (i32, i32) {
    %c0_i32 = arith.constant 0 : i32
    %c0_i32_0 = arith.constant 0 : i32
    %c0_i32_1 = arith.constant 0 : i32
    return %c0_i32, %c0_i32_0 : i32, i32
  }
  func.func @transform_2(%arg0: i32) -> (i32, i32) {
    %c0_i32 = arith.constant 0 : i32
    %c0_i32_0 = arith.constant 0 : i32
    %c0_i32_1 = arith.constant 0 : i32
    return %c0_i32, %c0_i32_0 : i32, i32
  }
  func.func @transform_3(%arg0: i32) -> (i32, i32) {
    %c0_i32 = arith.constant 0 : i32
    %c0_i32_0 = arith.constant 0 : i32
    %c0_i32_1 = arith.constant 0 : i32
    return %c0_i32, %c0_i32_0 : i32, i32
  }
  func.func @transform_4(%arg0: i32) -> (i32, i32) {
    %c0_i32 = arith.constant 0 : i32
    %c0_i32_0 = arith.constant 0 : i32
    %c0_i32_1 = arith.constant 0 : i32
    return %c0_i32, %c0_i32_0 : i32, i32
  }
  func.func @transform_5(%arg0: i32) -> (i32, i32) {
    %c0_i32 = arith.constant 0 : i32
    %c0_i32_0 = arith.constant 0 : i32
    %c0_i32_1 = arith.constant 0 : i32
    return %c0_i32, %c0_i32_0 : i32, i32
  }
  func.func @transform_6(%arg0: i32) -> (i32, i32) {
    %c0_i32 = arith.constant 0 : i32
    %c0_i32_0 = arith.constant 0 : i32
    %c0_i32_1 = arith.constant 0 : i32
    return %c0_i32, %c0_i32_0 : i32, i32
  }
  func.func @transform_7(%arg0: i32) -> (i32, i32) {
    %c0_i32 = arith.constant 0 : i32
    %c0_i32_0 = arith.constant 0 : i32
    return %arg0, %c0_i32 : i32, i32
  }
}

</mosaic_0001>

<bundles_post_ra>
// kernel: actor_forward.1
= control target key start
LH: loop header
LB: loop body
LE: loop exit
PB: predicated region body
PF: predicated region fallthrough
CT: control target
= control target key end

     0   :  { %v452_v0 = vmov 0.0   ;;  %vm453_vm0 = vmmov 0   ;;  %vm52_vm1 = vcmask 261120   ;;  %vm331_vm2 = vcmask 64512   ;;  %s587_s1 = inlined_call_operand.vmem [shape: bf16[32,128], index: 1, kind: input, shape index: {}]   ;;  %s588_s0 = inlined_call_operand.vmem [shape: f32[8,32], index: 0, kind: input, shape index: {}]   ;;  %s589_s3 = inlined_call_operand.vmem [shape: bf16[128,128], index: 3, kind: input, shape index: {}]   ;;  %s590_s5 = inlined_call_operand.vmem [shape: bf16[128,128], index: 5, kind: input, shape index: {}]   ;;  %s591_s2 = inlined_call_operand.vmem [shape: f32[1,128], index: 2, kind: input, shape index: {}]   ;;  %s592_s4 = inlined_call_operand.vmem [shape: f32[1,128], index: 4, kind: input, shape index: {}]   ;;  %s593_s6 = inlined_call_operand.vmem [shape: f32[1,128], index: 6, kind: input, shape index: {}]   ;;  %s594_s7 = inlined_call_operand.vmem [shape: f32[8,8], index: 7, kind: output, shape index: {}]  }
   0x1   :  { %380 = vmatprep.subr.bf16.mxu0 %v452_v0  ;;  %v430_v1 = vld [vmem:[%s587_s1] sm:$0xff]   ;;  %384 = vmatprep.mubr.msk.bf16.mxu0 %vm453_vm0, %v452_v0  ;;  %v431_v2 = vld [vmem:[%s587_s1 + $0x8] sm:$0xff]   ;;  %v434_v7 = vld [vmem:[%s589_s3 + $0x10] sm:$0xff]  }
   0x2   :  { %388 = vmatprep.subr.bf16.mxu1 %v452_v0  ;;  %404 = vmatprep.mubr.msk.bf16.mxu1 %vm453_vm0, %v452_v0  ;;  %v27_v3 = vld [vmem:[%s588_s0] sm:$0xff]  ;;  %v433_v6 = vld [vmem:[%s589_s3 + $0x8] sm:$0xff]   ;;  %v435_v8 = vld [vmem:[%s589_s3 + $0x18] sm:$0xff]  }
   0x3   :  { %381 = vmatpush3.bf16.msra.mxu0 %v430_v1  ;;  %v432_v4 = vld [vmem:[%s589_s3] sm:$0xff]   ;;  %v28_v5 = vpack.c.bf16 %v27_v3, %v27_v3  ;;  %v437_v10 = vld [vmem:[%s589_s3 + $0x28] sm:$0xff]   ;;  %v438_v11 = vld [vmem:[%s589_s3 + $0x30] sm:$0xff]  }
   0x4   :  { %382 = vmatprep.subr.bf16.mxu0 %v452_v0  ;;  %389 = vmatpush3.bf16.msra.mxu1 %v432_v4  ;;  %v436_v9 = vld [vmem:[%s589_s3 + $0x20] sm:$0xff]   ;;  %v439_v12 = vld [vmem:[%s589_s3 + $0x38] sm:$0xff]   ;;  %v441_v14 = vld [vmem:[%s590_s5 + $0x8] sm:$0xff]  }
   0x5   :  { %390 = vmatprep.subr.bf16.mxu1 %v452_v0  ;;  %v440_v13 = vld [vmem:[%s590_s5] sm:$0xff]   ;;  %v442_v15 = vld [vmem:[%s590_s5 + $0x10] sm:$0xff]   ;;  %v443_v16 = vld [vmem:[%s590_s5 + $0x18] sm:$0xff]  }
   0x6   :  { %v444_v17 = vld [vmem:[%s590_s5 + $0x20] sm:$0xff]   ;;  %v445_v18 = vld [vmem:[%s590_s5 + $0x28] sm:$0xff]   ;;  %v446_v27 = vld [vmem:[%s590_s5 + $0x30] sm:$0xff]  }
   0x7   :  { %383 = vmatpush3.bf16.msra.mxu0 %v431_v2  ;;  %v337_v19 = vld [vmem:[%s591_s2] ss:$0 sm:$0xff]  ;;  %v447_v28 = vld [vmem:[%s590_s5 + $0x38] sm:$0xff]  }
   0x8   :  { %408 = vmatprep.subr.bf16.mxu0 %v452_v0  ;;  %391 = vmatpush3.bf16.msra.mxu1 %v433_v6  ;;  %v341_v29 = vld [vmem:[%s592_s4] ss:$0 sm:$0xff] }
   0x9   :  { %392 = vmatprep.subr.bf16.mxu1 %v452_v0  ;;  %v350_v37 = vld [vmem:[%s593_s6] ss:$0 sm:$0xff] }
   0xa   :  { %385 = vmatmul.mubr.msk.bf16.vlgmr.msra.gmra.mrb[0].mxu0 %vm52_vm1, %v28_v5 }
   0xb   :  { %424 = vmatprep.mubr.msk.bf16.mxu0 %vm453_vm0, %v452_v0  ;;  %409 = vmatpush3.bf16.msra.mxu0 %v440_v13 }
   0xc   :  { %393 = vmatpush3.bf16.msra.mxu1 %v434_v7  ;;  %410 = vmatprep.subr.bf16.mxu0 %v452_v0 }
   0xd   :  { %394 = vmatprep.subr.bf16.mxu1 %v452_v0 }
   0xf   :  { %411 = vmatpush3.bf16.msra.mxu0 %v441_v14 }
  0x10   :  { %395 = vmatpush3.bf16.msra.mxu1 %v435_v8  ;;  %412 = vmatprep.subr.bf16.mxu0 %v452_v0 }
  0x11   :  { %396 = vmatprep.subr.bf16.mxu1 %v452_v0 }
  0x13   :  { %413 = vmatpush3.bf16.msra.mxu0 %v442_v15 }
  0x14   :  { %397 = vmatpush3.bf16.msra.mxu1 %v436_v9  ;;  %414 = vmatprep.subr.bf16.mxu0 %v452_v0 }
  0x15   :  { %398 = vmatprep.subr.bf16.mxu1 %v452_v0 }
  0x17   :  { %415 = vmatpush3.bf16.msra.mxu0 %v443_v16 }
  0x18   :  { %399 = vmatpush3.bf16.msra.mxu1 %v437_v10  ;;  %416 = vmatprep.subr.bf16.mxu0 %v452_v0 }
  0x19   :  { %400 = vmatprep.subr.bf16.mxu1 %v452_v0 }
  0x1b   :  { %417 = vmatpush3.bf16.msra.mxu0 %v444_v17 }
  0x1c   :  { %401 = vmatpush3.bf16.msra.mxu1 %v438_v11  ;;  %418 = vmatprep.subr.bf16.mxu0 %v452_v0 }
  0x1d   :  { %402 = vmatprep.subr.bf16.mxu1 %v452_v0 }
  0x1f   :  { %419 = vmatpush3.bf16.msra.mxu0 %v445_v18 }
  0x20   :  { %403 = vmatpush3.bf16.msra.mxu1 %v439_v12  ;;  %420 = vmatprep.subr.bf16.mxu0 %v452_v0 }
  0x23   :  { %421 = vmatpush3.bf16.msra.mxu0 %v446_v27 }
  0x24   :  { %422 = vmatprep.subr.bf16.mxu0 %v452_v0 }
  0x27   :  { %423 = vmatpush3.bf16.msra.mxu0 %v447_v28 }
  0xdd   :  { %v90_v20 = vpop.f32.mrb[0].mxu0 }
  0xde   :  { %v91_v21 = vadd.f32 %v337_v19, %v90_v20  ;;  %v386_v22 = vpop.f32.mrb[1].mxu0 }
  0xdf   :  { %v93_v23 = vpop.f32.mrb[2].mxu0 }
  0xe0   :  { %v96_v24 = vmax.f32 %v91_v21, 0.0  ;;  %v387_v25 = vpop.f32.mrb[3].mxu0 }
  0xe2   :  { %v97_v26 = vpack.c.bf16 %v96_v24, %v96_v24 }
  0xe4   :  { %405 = vmatmul.mubr.bf16.vlgmr.msra.gmra.mrb[0].mxu1 %v97_v26 }
 0x1b7   :  { %v203_v30 = vpop.f32.mrb[0].mxu1 }
 0x1b8   :  { %v204_v31 = vadd.f32 %v341_v29, %v203_v30  ;;  %v406_v32 = vpop.f32.mrb[1].mxu1 }
 0x1b9   :  { %v206_v33 = vpop.f32.mrb[2].mxu1 }
 0x1ba   :  { %v209_v34 = vmax.f32 %v204_v31, 0.0  ;;  %v407_v35 = vpop.f32.mrb[3].mxu1 }
 0x1bc   :  { %v210_v36 = vpack.c.bf16 %v209_v34, %v209_v34 }
 0x1be   :  { %425 = vmatmul.mubr.bf16.vlgmr.msra.gmra.mrb[4].mxu0 %v210_v36 }
 0x291   :  { %v316_v38 = vpop.f32.mrb[4].mxu0 }
 0x292   :  { %v317_v39 = vadd.f32 %v350_v37, %v316_v38  ;;  %v426_v40 = vpop.f32.mrb[5].mxu0 }
 0x293   :  { %v319_v41 = vpop.f32.mrb[6].mxu0 }
 0x294   :  { %322 = vmax.xlane.f32.xlu0 %v317_v39  ;;  %v427_v42 = vpop.f32.mrb[7].mxu0 }
 0x321   :  { %v323_v43 = vpop.xlane.xlu0 %322 }
 0x322   :  { %v324_v44 = vsub.f32 %v317_v39, %v323_v43 }
 0x324   :  { %v325_v45 = vmul.f32 1.442695, %v324_v44 }
 0x326   :  { %448 = vpow2.f32 %v325_v45 }
 0x330   :  { %v449_v46 = vpop.eup %448 }
 0x331   :  { %327 = vadd.xlane.f32.xlu0 %v449_v46 }
 0x3be   :  { %v328_v47 = vpop.xlane.xlu0 %327 }
 0x3bf   :  { %450 = vrcp.f32 %v328_v47 }
 0x3c9   :  { %v451_v48 = vpop.eup %450 }
 0x3ca   :  { %v330_v49 = vmul.f32 %v451_v48, %v449_v46 }
 0x3cc   :  { %332 = vst.msk [vmem:[%s594_s7] sm:$0xff] %vm331_vm2, %v330_v49 }

</bundles_post_ra>
